<compile_context>
chip_gen: v6e
topology: v6e:2x2x1
jax: 0.10.0
libtpu: 0.0.40
codegen_flags: <defaults>
</compile_context>

<pallas_src>
import jax
import jax.numpy as jnp
from jax.experimental import pallas as pl
from jax.experimental.pallas import tpu as pltpu


def dqn_head_kernel(x_ref, w1_ref, b1_ref, w2_ref, b2_ref, out_ref):
    # first_dense + ReLU -> (TB, 512), f32 accumulation
    h = jnp.dot(x_ref[...], w1_ref[...],
                preferred_element_type=jnp.float32) + b1_ref[...]
    h = jnp.maximum(h, 0.0)
    # fused (and dueling-folded) head -> (TB, A), f32 accumulation
    out_ref[...] = jnp.dot(h.astype(w2_ref.dtype), w2_ref[...],
                           preferred_element_type=jnp.float32) + b2_ref[...]


def _round_up(x, m):
    return ((x + m - 1) // m) * m


def dqn_head_forward(x, params, *, dueling=True, block_rows=2048):
    """x: (B, feat_dim) float32 -> q: (B, act_dim) float32."""
    B, F = x.shape
    H = params["w_1"].shape[1]          # 512
    A = params["w_q"].shape[1]

    # Fold the dueling combine into the head weights (exact for the forward
    # pass):  out = h @ (W_q - mean_cols(W_q) + W_v) + (b_q - mean(b_q) + b_v)
    if dueling:
        wq = params["w_q"]
        w2 = wq - jnp.mean(wq, axis=1, keepdims=True) + params["w_v"]     # (H, A)
        b2 = (params["b_q"] - jnp.mean(params["b_q"], axis=-1, keepdims=True)
              + params["b_v"])                                            # (1, A)
    else:
        w2, b2 = params["w_q"], params["b_q"]

    # bf16 operands for the MXU (f32 accumulation inside the kernel).
    x_bf = x.astype(jnp.bfloat16)
    w1_bf = params["w_1"].astype(jnp.bfloat16)
    w2_bf = w2.astype(jnp.bfloat16)
    b1 = params["b_1"].astype(jnp.float32)
    b2 = b2.astype(jnp.float32)

    # Row tiling: single full-batch tile for small B (no padding at all);
    # otherwise >=2 tiles (v7x megacore), multiples of 8 sublanes, <=2048 rows,
    # with padding bounded to a few sublanes.
    if B <= 256:
        n_tiles, TB, Bp = 1, B, B
    else:
        n_tiles = max(2, pl.cdiv(B, block_rows))
        TB = _round_up(pl.cdiv(B, n_tiles), 8)
        Bp = n_tiles * TB
    if Bp != B:
        x_bf = jnp.pad(x_bf, ((0, Bp - B), (0, 0)))
    grid = (n_tiles,)

    cost = pl.CostEstimate(
        flops=2 * Bp * (F * H + H * A),
        transcendentals=0,
        bytes_accessed=(2 * (Bp * F + F * H + H * A)      # bf16 operands
                        + 4 * (Bp * A + H + A)),          # f32 out + biases
    )

    q = pl.pallas_call(
        dqn_head_kernel,
        out_shape=jax.ShapeDtypeStruct((Bp, A), jnp.float32),
        grid_spec=pltpu.PrefetchScalarGridSpec(
            num_scalar_prefetch=0,
            grid=grid,
            in_specs=[
                pl.BlockSpec((TB, F), lambda i: (i, 0)),   # row tile of x (streamed)
                pl.BlockSpec((F, H), lambda i: (0, 0)),    # W1     (VMEM-resident)
                pl.BlockSpec((1, H), lambda i: (0, 0)),    # b1     (resident)
                pl.BlockSpec((H, A), lambda i: (0, 0)),    # W_eff  (resident)
                pl.BlockSpec((1, A), lambda i: (0, 0)),    # b_eff  (resident)
            ],
            out_specs=pl.BlockSpec((TB, A), lambda i: (i, 0)),
        ),
        compiler_params=pltpu.CompilerParams(
            dimension_semantics=("parallel",),
        ),
        cost_estimate=cost,
    )(x_bf, w1_bf, b1, w2_bf, b2)

    return q[:B] if Bp != B else q


def reference_forward(x, params, dueling=True):
    h = jnp.maximum(x @ params["w_1"] + params["b_1"], 0.0)
    q = h @ params["w_q"] + params["b_q"]
    if dueling:
        v = h @ params["w_v"] + params["b_v"]
        q = v + (q - q.mean(axis=-1, keepdims=True))
    return q


def make_params(key, feat_dim, act_dim, hidden=512):
    # Deterministic synthetic init (orthogonal-init semantics not required for
    # forward correctness; scaled normals keep values well-conditioned).
    ks = jax.random.split(key, 3)
    return {
        "w_1": jax.random.normal(ks[0], (feat_dim, hidden), jnp.float32) * 0.1,
        "b_1": jnp.zeros((1, hidden), jnp.float32),
        "w_q": jax.random.normal(ks[1], (hidden, act_dim), jnp.float32) * 0.01,
        "b_q": jnp.zeros((1, act_dim), jnp.float32),
        "w_v": jax.random.normal(ks[2], (hidden, 1), jnp.float32) * 0.05,
        "b_v": jnp.zeros((1, 1), jnp.float32),
    }


if __name__ == "__main__":
    feat_dim = 32  # feature dim of x
    act_dim = 4    # number of actions

    key = jax.random.PRNGKey(0)
    kx, kp, kx2 = jax.random.split(key, 3)
    params = make_params(kp, feat_dim, act_dim)

    # Small batch: single-tile, no-padding path.
    B = 2
    x = jax.random.normal(kx, (B, feat_dim), jnp.float32)

    q = jax.block_until_ready(dqn_head_forward(x, params, dueling=True))
    q_ref = reference_forward(x, params, dueling=True)
    assert q.shape == (B, act_dim)
    # bf16 operands (f32 accumulation) -> slightly looser tolerance vs f32 ref.
    assert jnp.allclose(q, q_ref, atol=3e-2, rtol=3e-2), "dueling mismatch"

    # Non-dueling path.
    q_nd = jax.block_until_ready(dqn_head_forward(x, params, dueling=False))
    q_nd_ref = reference_forward(x, params, dueling=False)
    assert jnp.allclose(q_nd, q_nd_ref, atol=3e-2, rtol=3e-2), "non-dueling mismatch"

    # Multi-tile path (>=2 grid steps, ragged tail padded by a few sublanes).
    B2 = 300
    x2 = jax.random.normal(kx2, (B2, feat_dim), jnp.float32)
    q2 = jax.block_until_ready(dqn_head_forward(x2, params, dueling=True))
    q2_ref = reference_forward(x2, params, dueling=True)
    assert q2.shape == (B2, act_dim)
    assert jnp.allclose(q2, q2_ref, atol=3e-2, rtol=3e-2), "multi-tile mismatch"

    print("KERNEL_OK")
</pallas_src>

<mosaic_0001>
module attributes {stable_mosaic.version = 11 : i64} {
  func.func @dqn_head_kernel(%arg0: i32, %arg1: memref<2x32xbf16, #tpu.memory_space<vmem>>, %arg2: memref<32x512xbf16, #tpu.memory_space<vmem>>, %arg3: memref<1x512xf32, #tpu.memory_space<vmem>>, %arg4: memref<512x4xbf16, #tpu.memory_space<vmem>>, %arg5: memref<1x4xf32, #tpu.memory_space<vmem>>, %arg6: memref<2x4xf32, #tpu.memory_space<vmem>>) attributes {dimension_semantics = [#tpu.dimension_semantics<parallel>], iteration_bounds = array<i64: 1>, scalar_prefetch = 0 : i64, scratch_operands = 0 : i64, tpu.core_type = #tpu.core_type<tc>, window_params = [{transform_indices = @transform_0, window_bounds = array<i64: 2, 32>}, {pipeline_mode = #tpu.pipeline_mode<synchronous>, transform_indices = @transform_1, window_bounds = array<i64: 32, 512>}, {pipeline_mode = #tpu.pipeline_mode<synchronous>, transform_indices = @transform_2, window_bounds = array<i64: 1, 512>}, {pipeline_mode = #tpu.pipeline_mode<synchronous>, transform_indices = @transform_3, window_bounds = array<i64: 512, 4>}, {pipeline_mode = #tpu.pipeline_mode<synchronous>, transform_indices = @transform_4, window_bounds = array<i64: 1, 4>}, {transform_indices = @transform_5, window_bounds = array<i64: 2, 4>}]} {
    %c0 = arith.constant 0 : index
    %c0_0 = arith.constant 0 : index
    %0 = vector.load %arg1[%c0, %c0_0] : memref<2x32xbf16, #tpu.memory_space<vmem>>, vector<2x32xbf16>
    %c0_1 = arith.constant 0 : index
    %c0_2 = arith.constant 0 : index
    %1 = vector.load %arg2[%c0_1, %c0_2] : memref<32x512xbf16, #tpu.memory_space<vmem>>, vector<32x512xbf16>
    %cst = arith.constant dense<0.000000e+00> : vector<2x512xf32>
    %2 = tpu.matmul %0, %1, %cst {dimension_numbers = #tpu.dot_dimension_numbers<[1], [0], [0], [1], [0, 0, 1, 1], [], []>} : vector<2x32xbf16>, vector<32x512xbf16>, vector<2x512xf32> -> vector<2x512xf32>
    %c0_3 = arith.constant 0 : index
    %c0_4 = arith.constant 0 : index
    %3 = vector.load %arg3[%c0_3, %c0_4] : memref<1x512xf32, #tpu.memory_space<vmem>>, vector<1x512xf32>
    %4 = vector.broadcast %3 : vector<1x512xf32> to vector<2x512xf32>
    %5 = arith.addf %2, %4 : vector<2x512xf32>
    %cst_5 = arith.constant 0.000000e+00 : f32
    %6 = vector.broadcast %cst_5 : f32 to vector<2x512xf32>
    %7 = arith.maximumf %5, %6 : vector<2x512xf32>
    %8 = arith.truncf %7 : vector<2x512xf32> to vector<2x512xbf16>
    %c0_6 = arith.constant 0 : index
    %c0_7 = arith.constant 0 : index
    %9 = vector.load %arg4[%c0_6, %c0_7] : memref<512x4xbf16, #tpu.memory_space<vmem>>, vector<512x4xbf16>
    %cst_8 = arith.constant dense<0.000000e+00> : vector<2x4xf32>
    %10 = tpu.matmul %8, %9, %cst_8 {dimension_numbers = #tpu.dot_dimension_numbers<[1], [0], [0], [1], [0, 0, 1, 1], [], []>} : vector<2x512xbf16>, vector<512x4xbf16>, vector<2x4xf32> -> vector<2x4xf32>
    %c0_9 = arith.constant 0 : index
    %c0_10 = arith.constant 0 : index
    %11 = vector.load %arg5[%c0_9, %c0_10] : memref<1x4xf32, #tpu.memory_space<vmem>>, vector<1x4xf32>
    %12 = vector.broadcast %11 : vector<1x4xf32> to vector<2x4xf32>
    %13 = arith.addf %10, %12 : vector<2x4xf32>
    %c0_11 = arith.constant 0 : index
    %c0_12 = arith.constant 0 : index
    %14 = vector.load %arg6[%c0_11, %c0_12] : memref<2x4xf32, #tpu.memory_space<vmem>>, vector<2x4xf32>
    tpu.vector_store %arg6[%c0_11, %c0_12], %13 {strides = array<i32>} : memref<2x4xf32, #tpu.memory_space<vmem>>, vector<2x4xf32>,
    return
  }
  func.func @transform_0(%arg0: i32) -> (i32, i32) {
    %c0_i32 = arith.constant 0 : i32
    %c0_i32_0 = arith.constant 0 : i32
    return %arg0, %c0_i32 : i32, i32
  }
  func.func @transform_1(%arg0: i32) -> (i32, i32) {
    %c0_i32 = arith.constant 0 : i32
    %c0_i32_0 = arith.constant 0 : i32
    %c0_i32_1 = arith.constant 0 : i32
    return %c0_i32, %c0_i32_0 : i32, i32
  }
  func.func @transform_2(%arg0: i32) -> (i32, i32) {
    %c0_i32 = arith.constant 0 : i32
    %c0_i32_0 = arith.constant 0 : i32
    %c0_i32_1 = arith.constant 0 : i32
    return %c0_i32, %c0_i32_0 : i32, i32
  }
  func.func @transform_3(%arg0: i32) -> (i32, i32) {
    %c0_i32 = arith.constant 0 : i32
    %c0_i32_0 = arith.constant 0 : i32
    %c0_i32_1 = arith.constant 0 : i32
    return %c0_i32, %c0_i32_0 : i32, i32
  }
  func.func @transform_4(%arg0: i32) -> (i32, i32) {
    %c0_i32 = arith.constant 0 : i32
    %c0_i32_0 = arith.constant 0 : i32
    %c0_i32_1 = arith.constant 0 : i32
    return %c0_i32, %c0_i32_0 : i32, i32
  }
  func.func @transform_5(%arg0: i32) -> (i32, i32) {
    %c0_i32 = arith.constant 0 : i32
    %c0_i32_0 = arith.constant 0 : i32
    return %arg0, %c0_i32 : i32, i32
  }
}

</mosaic_0001>

<bundles_post_ra>
// kernel: tpu_custom_call.1
= control target key start
LH: loop header
LB: loop body
LE: loop exit
PB: predicated region body
PF: predicated region fallthrough
CT: control target
= control target key end

     0   :  { %v701_v2 = vmov 0   ;;  %vm93_vm0 = vcmask 261120   ;;  %s865_s0 = inlined_call_operand.vmem [shape: bf16[2,32], index: 0, kind: input, shape index: {}]   ;;  %s866_s1 = inlined_call_operand.vmem [shape: bf16[32,512], index: 1, kind: input, shape index: {}]   ;;  %s867_s2 = inlined_call_operand.vmem [shape: f32[1,512], index: 2, kind: input, shape index: {}]   ;;  %s868_s3 = inlined_call_operand.vmem [shape: bf16[512,4], index: 3, kind: input, shape index: {}]   ;;  %s869_s4 = inlined_call_operand.vmem [shape: f32[1,4], index: 4, kind: input, shape index: {}]   ;;  %s870_s5 = inlined_call_operand.hbm [shape: f32[2,4], index: 5, kind: output, shape index: {}]  }
   0x1   :  { %v635_v0 = vld [vmem:[%s866_s1 + $0x24] ss:$16 sps:$4 sm:$0xff]   ;;  %v637_v1 = vld [vmem:[%s866_s1 + $0x2c] ss:$16 sps:$4 sm:$0xff]   ;;  %129 = vmatprep.mubr.bf16.mxu0 %v701_v2  ;;  %170 = vmatprep.mubr.bf16.mxu1 %v701_v2  ;;  %v639_v3 = vld [vmem:[%s866_s1 + $0x20] ss:$16 sps:$4 sm:$0xff]  }
   0x2   :  { %109 = vmatprep.subr.bf16.mxu0 %v635_v0  ;;  %v640_v4 = vld [vmem:[%s866_s1 + $0x28] ss:$16 sps:$4 sm:$0xff]   ;;  %150 = vmatprep.subr.bf16.mxu1 %v637_v1  ;;  %v641_v5 = vld [vmem:[%s866_s1 + $0x4] ss:$16 sps:$4 sm:$0xff]   ;;  %v643_v6 = vld [vmem:[%s866_s1 + $0xc] ss:$16 sps:$4 sm:$0xff]  }
   0x3   :  { %110 = vmatpush1.bf16.msra.mxu0 %v639_v3  ;;  %151 = vmatpush1.bf16.msra.mxu1 %v640_v4  ;;  %v645_v7 = vld [vmem:[%s866_s1] ss:$16 sps:$4 sm:$0xff]   ;;  %v646_v8 = vld [vmem:[%s866_s1 + $0x8] ss:$16 sps:$4 sm:$0xff]  }
   0x4   :  { %111 = vmatprep.subr.bf16.mxu0 %v641_v5  ;;  %152 = vmatprep.subr.bf16.mxu1 %v643_v6  ;;  %v22_v9 = vld [vmem:[%s865_s0] sm:$0x1]  ;;  %v647_v10 = vld [vmem:[%s868_s3 + $0x78] sm:$0xff]   ;;  %v651_v14 = vld [vmem:[%s868_s3 + $0x70] sm:$0xff]  }
   0x5   :  { %v648_v11 = vld [vmem:[%s868_s3 + $0xf8] sm:$0xff]   ;;  %v652_v15 = vld [vmem:[%s868_s3 + $0xf0] sm:$0xff]   ;;  %v655_v18 = vld [vmem:[%s868_s3 + $0x68] sm:$0xff]  }
   0x6   :  { %v649_v12 = vld [vmem:[%s868_s3 + $0x38] sm:$0xff]   ;;  %v653_v16 = vld [vmem:[%s868_s3 + $0x30] sm:$0xff]   ;;  %v656_v19 = vld [vmem:[%s868_s3 + $0xe8] sm:$0xff]  }
   0x7   :  { %112 = vmatpush1.bf16.msra.mxu0 %v645_v7  ;;  %153 = vmatpush1.bf16.msra.mxu1 %v646_v8  ;;  %v650_v13 = vld [vmem:[%s868_s3 + $0xb8] sm:$0xff]   ;;  %v654_v17 = vld [vmem:[%s868_s3 + $0xb0] sm:$0xff]   ;;  %v657_v20 = vld [vmem:[%s868_s3 + $0x28] sm:$0xff]  }
   0x8   :  { %589 = vmatprep.subr.bf16.mxu0 %v647_v10  ;;  %611 = vmatprep.subr.bf16.mxu1 %v648_v11  ;;  %v658_v21 = vld [vmem:[%s868_s3 + $0xa8] sm:$0xff]   ;;  %v659_v22 = vld [vmem:[%s868_s3 + $0x60] sm:$0xff]   ;;  %v663_v26 = vld [vmem:[%s868_s3 + $0x58] sm:$0xff]  }
   0x9   :  { %v660_v23 = vld [vmem:[%s868_s3 + $0xe0] sm:$0xff]   ;;  %v664_v27 = vld [vmem:[%s868_s3 + $0xd8] sm:$0xff]   ;;  %v667_v30 = vld [vmem:[%s868_s3 + $0x50] sm:$0xff]  }
   0xa   :  { %554 = vmatmul.mubr.msk.bf16.vlgmr.msra.gmra.mxu0 %vm93_vm0, %v22_v9  ;;  %555 = vmatmul.mubr.msk.bf16.vlgmr.msra.gmra.mxu1 %vm93_vm0, %v22_v9  ;;  %v661_v24 = vld [vmem:[%s868_s3 + $0x20] sm:$0xff]   ;;  %v665_v28 = vld [vmem:[%s868_s3 + $0x18] sm:$0xff]   ;;  %v668_v31 = vld [vmem:[%s868_s3 + $0xd0] sm:$0xff]  }
   0xb   :  { %590 = vmatpush3.bf16.msra.mxu0 %v649_v12  ;;  %612 = vmatpush3.bf16.msra.mxu1 %v650_v13  ;;  %v662_v25 = vld [vmem:[%s868_s3 + $0xa0] sm:$0xff]   ;;  %v666_v29 = vld [vmem:[%s868_s3 + $0x98] sm:$0xff]   ;;  %v669_v32 = vld [vmem:[%s868_s3 + $0x10] sm:$0xff]  }
   0xc   :  { %591 = vmatprep.subr.bf16.mxu0 %v651_v14  ;;  %613 = vmatprep.subr.bf16.mxu1 %v652_v15  ;;  %v670_v33 = vld [vmem:[%s868_s3 + $0x90] sm:$0xff]  }
   0xf   :  { %592 = vmatpush3.bf16.msra.mxu0 %v653_v16  ;;  %614 = vmatpush3.bf16.msra.mxu1 %v654_v17 }
  0x10   :  { %593 = vmatprep.subr.bf16.mxu0 %v655_v18  ;;  %615 = vmatprep.subr.bf16.mxu1 %v656_v19 }
  0x13   :  { %594 = vmatpush3.bf16.msra.mxu0 %v657_v20  ;;  %616 = vmatpush3.bf16.msra.mxu1 %v658_v21 }
  0x14   :  { %595 = vmatprep.subr.bf16.mxu0 %v659_v22  ;;  %617 = vmatprep.subr.bf16.mxu1 %v660_v23 }
  0x17   :  { %596 = vmatpush3.bf16.msra.mxu0 %v661_v24  ;;  %618 = vmatpush3.bf16.msra.mxu1 %v662_v25 }
  0x18   :  { %597 = vmatprep.subr.bf16.mxu0 %v663_v26  ;;  %619 = vmatprep.subr.bf16.mxu1 %v664_v27 }
  0x1b   :  { %598 = vmatpush3.bf16.msra.mxu0 %v665_v28  ;;  %620 = vmatpush3.bf16.msra.mxu1 %v666_v29 }
  0x1c   :  { %599 = vmatprep.subr.bf16.mxu0 %v667_v30  ;;  %621 = vmatprep.subr.bf16.mxu1 %v668_v31 }
  0x1f   :  { %600 = vmatpush3.bf16.msra.mxu0 %v669_v32  ;;  %622 = vmatpush3.bf16.msra.mxu1 %v670_v33 }
  0x20   :  { %10 = vsyncpa [#allocation3], 0  ;;  %v671_v34 = vld [vmem:[%s868_s3 + $0x48] sm:$0xff]   ;;  %v675_v38 = vld [vmem:[%s868_s3 + $0x40] sm:$0xff]   ;;  %v33_v42 = vlaneseq  ;;  %s702_s21 = smov [#allocation2]   ;;  %vm530_vm1 = vcmask 25600  }
  0x21   :  { %v672_v35 = vld [vmem:[%s868_s3 + $0xc8] sm:$0xff]   ;;  %601 = vmatprep.subr.bf16.mxu0 %v671_v34  ;;  %v676_v39 = vld [vmem:[%s868_s3 + $0xc0] sm:$0xff]   ;;  %s538_s22 = sshll.u32 %s702_s21, 4  ;;  %s539_s22 = int_to_ptr.vmem [resolvable:$true] %s538_s22 }
  0x22   :  { %v673_v36 = vld [vmem:[%s868_s3 + $0x8] sm:$0xff]   ;;  %623 = vmatprep.subr.bf16.mxu1 %v672_v35  ;;  %v677_v40 = vld [vmem:[%s868_s3] sm:$0xff]   ;;  %v34_v43 = vshrl.u32 %v33_v42, 7  ;;  %s679_s23 = scalar_lea.vmem %s539_s22, 32  ;;  %p684_p1 = scmp.lt.s32.totalorder %s539_s22, %s539_s22 }
  0x23   :  { %v674_v37 = vld [vmem:[%s868_s3 + $0x88] sm:$0xff]   ;;  %602 = vmatpush3.bf16.msra.mxu0 %v673_v36  ;;  %v678_v41 = vld [vmem:[%s868_s3 + $0x80] sm:$0xff]   ;;  %p680_p0 = scmp.ne.s32.totalorder %s539_s22, %s679_s23  ;;  %p685_p2 = scmp.lt.s32.totalorder %s679_s23, %s679_s23 }
  0x24   :  { %624 = vmatpush3.bf16.msra.mxu1 %v674_v37  ;;  %603 = vmatprep.subr.bf16.mxu0 %v675_v38  ;;  %v35_v44 = vsub.s32 0, %v34_v43  ;;  %v43_v45 = vsub.s32 2, %v34_v43  ;;  %v31_v46 = vld [vmem:[%s867_s2] sm:$0xf]  ;;  %v39_v47 = vsub.s32 1, %v34_v43  ;;  %v47_v48 = vsub.s32 3, %v34_v43 }
  0x25   :  { %625 = vmatprep.subr.bf16.mxu1 %v676_v39  ;;  %v556_v11 = vld [vmem:[%s869_s4] ss:$0 sm:$0xff]  ;;  %p686_p3 = por %p685_p2, %p684_p1 }
  0x26   :  { %v36_v49 = vrot.slane %v31_v46, %v35_v44  ;;  %v44_v50 = vrot.slane %v31_v46, %v43_v45  ;;  %v40_v51 = vrot.slane %v31_v46, %v39_v47  ;;  %v48_v52 = vrot.slane %v31_v46, %v47_v48 }
  0x27   :  { %604 = vmatpush3.bf16.msra.mxu0 %v677_v40  ;;  %p687_p4 = pnand %p686_p3, %p680_p0 }
  0x28   :  { %626 = vmatpush3.bf16.msra.mxu1 %v678_v41 }
  0xca   :  { %v131_v53 = vpop.f32.mrf.mxu0  ;;  %v172_v54 = vpop.f32.mrf.mxu1 }
  0xcb   :  { %v132_v55 = vadd.f32 %v131_v53, %v36_v49  ;;  %v173_v56 = vadd.f32 %v172_v54, %v44_v50 }
  0xcc   :  { %v133_v57 = vpop.f32.mrf.mxu0  ;;  %v174_v58 = vpop.f32.mrf.mxu1 }
  0xcd   :  { %v181_v59 = vmax.f32 %v173_v56, 0.0  ;;  %v134_v60 = vadd.f32 %v133_v57, %v40_v51  ;;  %v175_v61 = vadd.f32 %v174_v58, %v48_v52  ;;  %v179_v62 = vmax.f32 %v132_v55, 0.0 }
  0xce   :  { %v135_v63 = vpop.f32.mrf.mxu0  ;;  %v176_v0 = vpop.f32.mrf.mxu1 }
  0xcf   :  { %v180_v1 = vmax.f32 %v134_v60, 0.0  ;;  %v182_v2 = vmax.f32 %v175_v61, 0.0  ;;  %v185_v3 = vpack.c.bf16 %v181_v59, %v181_v59  ;;  %v183_v8 = vpack.c.bf16 %v179_v62, %v179_v62 }
  0xd0   :  { %v136_v4 = vpop.f32.mrf.mxu0  ;;  %v177_v5 = vpop.f32.mrf.mxu1 }
  0xd1   :  { %v184_v6 = vpack.c.bf16 %v180_v1, %v180_v1  ;;  %v186_v7 = vpack.c.bf16 %v182_v2, %v182_v2 }
  0xd3   :  { %482 = vmatprep.mubr.bf16.mxu0 %v184_v6  ;;  %522 = vmatprep.mubr.bf16.mxu1 %v186_v7 }
  0xd4   :  { %483 = vmatmul.mubr.bf16.vlgmr.msra.gmra.mxu0 %v183_v8  ;;  %523 = vmatmul.mubr.bf16.vlgmr.msra.gmra.mxu1 %v185_v3 }
 0x194   :  { %v605_v9 = vpop.f32.mrf.mxu0  ;;  %v627_v10 = vpop.f32.mrf.mxu1 }
 0x196   :  { %v606_v12 = vpop.f32.mrf.mxu0  ;;  %v628_v13 = vpop.f32.mrf.mxu1 }
 0x197   :  { %v607_v14 = vadd.f32 %v606_v12, %v605_v9  ;;  %v629_v18 = vadd.f32 %v628_v13, %v627_v10 }
 0x198   :  { %v608_v15 = vpop.f32.mrf.mxu0  ;;  %v630_v16 = vpop.f32.mrf.mxu1 }
 0x199   :  { %v485_v17 = vadd.f32 %v607_v14, %v556_v11 }
 0x19a   :  { %v609_v19 = vpop.f32.mrf.mxu0  ;;  %v631_v20 = vpop.f32.mrf.mxu1 }
 0x19b   :  { %v525_v21 = vadd.f32 %v629_v18, %v485_v17 }
 0x19d   :  { %531 = vst.msk [vmem:[#allocation2] sm:$0x3] %vm530_vm1, %v525_v21 }
 0x19e   :  { %690 = shalt.err (!%p687_p4)
}
 0x19f   :  { %541 = dma.vmem_to_hbm [thread:$0]  %s539_s22, 32, %s870_s5, [#allocation3]  }
 0x1a0   :  { %699 = dma.done.wait [#allocation3], 32  }
 0x1a1   :  { %700 = vsyncadd [#allocation3], 4294967264 }
 0x1a2   :  { %545 = vsyncpa [#allocation3], 1 }

</bundles_post_ra>
